<compile_context>
chip_gen: v6e
topology: v6e:2x2x1
jax: 0.10.0
libtpu: 0.0.40
codegen_flags: <defaults>
</compile_context>

<pallas_src>
import functools

import jax
import jax.numpy as jnp
from jax.experimental import pallas as pl
from jax.experimental.pallas import tpu as pltpu


# Large lane-dense column tile (multiple of 128).  Per grid step this moves
# (C4 + C2) * tm * itemsize bytes, which for YOLO-style channel counts is a few
# MB -- comfortably above the ~0.35us fixed per-step pipeline overhead.
_TM_TARGET = 8192
# Cap the double-buffered in+out tile footprint so the kernel never approaches
# the v7x 64 MiB (32 MiB scoped-default) VMEM budget.
_VMEM_TILE_BUDGET = 24 * 1024 * 1024


def _focus_conv_kernel(x_ref, w_ref, b_ref, o_ref):
    # x_ref : (C4, tm)  channels-first activation tile, lane-dense over tm
    # w_ref : (C2, C4)  1x1-conv weight with eval-mode BN scale folded in
    # b_ref : (C2, 1)   folded BN bias (f32), broadcasts over the tm lanes
    # o_ref : (C2, tm)  lane-dense output tile -> unmasked full-lane stores
    y = jnp.dot(w_ref[...], x_ref[...], preferred_element_type=jnp.float32)
    y = y + b_ref[...]
    # SiLU: y * sigmoid(y).  exp routes to the EUP slot; the exact reciprocal
    # stays on the VALU which has ample slack in this HBM-bound kernel.
    sig = pl.reciprocal(1.0 + jnp.exp(-y))
    o_ref[...] = (y * sig).astype(o_ref.dtype)


@functools.partial(jax.jit, static_argnames=("eps",))
def focus_forward(x, w, gamma, beta, running_mean, running_var, eps=1e-5):
    """Focus forward: x is NCHW (B, C1, H, W); returns NCHW (B, C2, H//2, W//2)."""
    B, C1, H, W = x.shape
    H2, W2 = H // 2, W // 2
    C4 = 4 * C1
    C2 = w.shape[0]
    N2 = H2 * W2  # output columns per image

    # --- space-to-depth + channels-first relayout (one XLA transpose) --------
    # Channel order matches torch.cat([::2,::2], [1::2,::2], [::2,1::2],
    # [1::2,1::2]) i.e. c4 = (2*w_off + h_off)*C1 + c1; columns are (h2, w2),
    # which is exactly the NCHW column order the kernel writes.
    # TODO(synk): fusing this 2x2 deinterleave into the kernel (lane-strided
    # loads on raw NCHW blocks) would remove one extra read+write of the small
    # input tensor; kept in XLA because lane-strided in-kernel loads do not
    # lower reliably across Mosaic versions.
    x6 = x.reshape(B, C1, H2, 2, W2, 2)
    xs = x6.transpose(0, 5, 3, 1, 2, 4).reshape(B, C4, N2)

    # --- fold eval-mode BatchNorm into the 1x1 conv weight + per-channel bias -
    scale = gamma.astype(jnp.float32) * jax.lax.rsqrt(
        running_var.astype(jnp.float32) + eps)                       # (C2,)
    w_eff = (w.reshape(C2, C4).astype(jnp.float32) * scale[:, None]).astype(x.dtype)
    bias = (beta.astype(jnp.float32)
            - running_mean.astype(jnp.float32) * scale).reshape(C2, 1)  # f32

    # --- tiling: big lane-dense column tiles, no padding, ragged last block ---
    itemsize = jnp.dtype(x.dtype).itemsize
    tm_cap = max(128, (_VMEM_TILE_BUDGET // (2 * (C4 + C2) * itemsize)) // 128 * 128)
    tm = min(_TM_TARGET, tm_cap)
    if N2 <= tm:
        tm = N2  # single block == full dim -> always layout-legal
    grid = (B, pl.cdiv(N2, tm))  # ragged last block: per-column elementwise,
                                 # OOB reads harmless, OOB writes dropped.

    cost = pl.CostEstimate(
        flops=2 * B * N2 * C4 * C2,
        transcendentals=B * N2 * C2,
        bytes_accessed=itemsize * B * N2 * (C4 + C2) + 4 * C2 * (C4 + 1),
    )

    out = pl.pallas_call(
        _focus_conv_kernel,
        out_shape=jax.ShapeDtypeStruct((B, C2, N2), x.dtype),
        grid_spec=pltpu.PrefetchScalarGridSpec(
            num_scalar_prefetch=0,
            grid=grid,
            in_specs=[
                pl.BlockSpec((None, C4, tm), lambda b, i: (b, 0, i)),  # activations
                pl.BlockSpec((C2, C4), lambda b, i: (0, 0)),           # folded weight
                pl.BlockSpec((C2, 1), lambda b, i: (0, 0)),            # folded bias
            ],
            out_specs=pl.BlockSpec((None, C2, tm), lambda b, i: (b, 0, i)),
        ),
        compiler_params=pltpu.CompilerParams(
            dimension_semantics=("parallel", "parallel"),
        ),
        cost_estimate=cost,
    )(xs, w_eff, bias)

    # Kernel already emitted NCHW channel/column order; this reshape is free.
    return out.reshape(B, C2, H2, W2)


def _reference(x, w, gamma, beta, running_mean, running_var, eps=1e-5):
    """Pure-JAX reference mirroring the PyTorch module (eval-mode BN)."""
    xs = jnp.concatenate(
        [x[..., ::2, ::2], x[..., 1::2, ::2], x[..., ::2, 1::2], x[..., 1::2, 1::2]],
        axis=1,
    )
    y = jax.lax.conv_general_dilated(
        xs, w, window_strides=(1, 1), padding="VALID",
        dimension_numbers=("NCHW", "OIHW", "NCHW"),
    )
    scale = (gamma / jnp.sqrt(running_var + eps)).reshape(1, -1, 1, 1)
    bias = (beta - running_mean * gamma / jnp.sqrt(running_var + eps)).reshape(1, -1, 1, 1)
    z = y * scale + bias
    return z * jax.nn.sigmoid(z)


if __name__ == "__main__":
    key = jax.random.PRNGKey(0)
    k_x, k_w, k_g, k_b, k_m, k_v = jax.random.split(key, 6)

    B, C1, H, W = 2, 4, 16, 16
    C2 = 8
    C4 = 4 * C1

    x = jax.random.normal(k_x, (B, C1, H, W), dtype=jnp.float32)
    # Conv2d(c1*4, c2, k=1, bias=False) weight: (C2, 4*C1, 1, 1)
    w = jax.random.normal(k_w, (C2, C4, 1, 1), dtype=jnp.float32) * 0.1
    # BatchNorm2d(c2) parameters / running stats (deterministic, non-trivial)
    gamma = 1.0 + 0.1 * jax.random.normal(k_g, (C2,), dtype=jnp.float32)
    beta = 0.1 * jax.random.normal(k_b, (C2,), dtype=jnp.float32)
    running_mean = 0.1 * jax.random.normal(k_m, (C2,), dtype=jnp.float32)
    running_var = 1.0 + 0.1 * jax.nn.softplus(
        jax.random.normal(k_v, (C2,), dtype=jnp.float32))

    out = focus_forward(x, w, gamma, beta, running_mean, running_var)
    out = jax.block_until_ready(out)

    ref = _reference(x, w, gamma, beta, running_mean, running_var)
    assert out.shape == (B, C2, H // 2, W // 2), out.shape
    assert jnp.allclose(out, ref, atol=1e-5, rtol=1e-5), float(jnp.max(jnp.abs(out - ref)))

    print("KERNEL_OK")
</pallas_src>

<mosaic_0001>
module attributes {stable_mosaic.version = 11 : i64} {
  func.func @_focus_conv_kernel(%arg0: i32, %arg1: i32, %arg2: memref<1x16x64xf32, #tpu.memory_space<vmem>>, %arg3: memref<8x16xf32, #tpu.memory_space<vmem>>, %arg4: memref<8x1xf32, #tpu.memory_space<vmem>>, %arg5: memref<1x8x64xf32, #tpu.memory_space<vmem>>) attributes {dimension_semantics = [#tpu.dimension_semantics<parallel>, #tpu.dimension_semantics<parallel>], iteration_bounds = array<i64: 2, 1>, scalar_prefetch = 0 : i64, scratch_operands = 0 : i64, tpu.core_type = #tpu.core_type<tc>, window_params = [{transform_indices = @transform_0, window_bounds = array<i64: 1, 16, 64>}, {pipeline_mode = #tpu.pipeline_mode<synchronous>, transform_indices = @transform_1, window_bounds = array<i64: 8, 16>}, {pipeline_mode = #tpu.pipeline_mode<synchronous>, transform_indices = @transform_2, window_bounds = array<i64: 8, 1>}, {transform_indices = @transform_3, window_bounds = array<i64: 1, 8, 64>}]} {
    %c0 = arith.constant 0 : index
    %c0_0 = arith.constant 0 : index
    %0 = vector.load %arg3[%c0, %c0_0] : memref<8x16xf32, #tpu.memory_space<vmem>>, vector<8x16xf32>
    %c0_1 = arith.constant 0 : index
    %c0_2 = arith.constant 0 : index
    %c0_3 = arith.constant 0 : index
    %1 = vector.load %arg2[%c0_1, %c0_2, %c0_3] : memref<1x16x64xf32, #tpu.memory_space<vmem>>, vector<1x16x64xf32>
    %2 = vector.shape_cast %1 : vector<1x16x64xf32> to vector<16x64xf32>
    %cst = arith.constant dense<0.000000e+00> : vector<8x64xf32>
    %3 = tpu.matmul %0, %2, %cst {dimension_numbers = #tpu.dot_dimension_numbers<[1], [0], [0], [1], [0, 0, 1, 1], [], []>} : vector<8x16xf32>, vector<16x64xf32>, vector<8x64xf32> -> vector<8x64xf32>
    %c0_4 = arith.constant 0 : index
    %c0_5 = arith.constant 0 : index
    %4 = vector.load %arg4[%c0_4, %c0_5] : memref<8x1xf32, #tpu.memory_space<vmem>>, vector<8x1xf32>
    %5 = vector.broadcast %4 : vector<8x1xf32> to vector<8x64xf32>
    %6 = arith.addf %3, %5 : vector<8x64xf32>
    %cst_6 = arith.constant 0.000000e+00 : f32
    %7 = vector.broadcast %cst_6 : f32 to vector<8x64xf32>
    %8 = arith.subf %7, %6 : vector<8x64xf32>
    %9 = math.exp %8 : vector<8x64xf32>
    %cst_7 = arith.constant 1.000000e+00 : f32
    %10 = vector.broadcast %cst_7 : f32 to vector<8x64xf32>
    %11 = arith.addf %10, %9 : vector<8x64xf32>
    %12 = tpu.reciprocal %11 : vector<8x64xf32> -> vector<8x64xf32>
    %13 = arith.mulf %6, %12 : vector<8x64xf32>
    %c0_8 = arith.constant 0 : index
    %c0_9 = arith.constant 0 : index
    %c0_10 = arith.constant 0 : index
    %14 = vector.load %arg5[%c0_8, %c0_9, %c0_10] : memref<1x8x64xf32, #tpu.memory_space<vmem>>, vector<1x8x64xf32>
    %15 = vector.shape_cast %14 : vector<1x8x64xf32> to vector<8x64xf32>
    %16 = vector.shape_cast %13 : vector<8x64xf32> to vector<1x8x64xf32>
    tpu.vector_store %arg5[%c0_8, %c0_9, %c0_10], %16 {strides = array<i32>} : memref<1x8x64xf32, #tpu.memory_space<vmem>>, vector<1x8x64xf32>,
    return
  }
  func.func @transform_0(%arg0: i32, %arg1: i32) -> (i32, i32, i32) {
    %c0_i32 = arith.constant 0 : i32
    %c0_i32_0 = arith.constant 0 : i32
    return %arg0, %c0_i32, %arg1 : i32, i32, i32
  }
  func.func @transform_1(%arg0: i32, %arg1: i32) -> (i32, i32) {
    %c0_i32 = arith.constant 0 : i32
    %c0_i32_0 = arith.constant 0 : i32
    %c0_i32_1 = arith.constant 0 : i32
    return %c0_i32, %c0_i32_0 : i32, i32
  }
  func.func @transform_2(%arg0: i32, %arg1: i32) -> (i32, i32) {
    %c0_i32 = arith.constant 0 : i32
    %c0_i32_0 = arith.constant 0 : i32
    %c0_i32_1 = arith.constant 0 : i32
    return %c0_i32, %c0_i32_0 : i32, i32
  }
  func.func @transform_3(%arg0: i32, %arg1: i32) -> (i32, i32, i32) {
    %c0_i32 = arith.constant 0 : i32
    %c0_i32_0 = arith.constant 0 : i32
    return %arg0, %c0_i32, %arg1 : i32, i32, i32
  }
}

</mosaic_0001>

<bundles_post_ra>
// kernel: focus_forward.1
= control target key start
LH: loop header
LB: loop body
LE: loop exit
PB: predicated region body
PF: predicated region fallthrough
CT: control target
= control target key end

     0   :  { %s469_s12 = smov 0   ;;  %s471_s13 = smov 0   ;;  %s508_s0 = inlined_call_operand.vmem [shape: f32[2,16,64], index: 0, kind: input, shape index: {}]   ;;  %s509_s1 = inlined_call_operand.vmem [shape: f32[8,16], index: 1, kind: input, shape index: {}]   ;;  %s510_s2 = inlined_call_operand.vmem [shape: f32[8,1], index: 2, kind: input, shape index: {}]   ;;  %s511_s3 = inlined_call_operand.vmem [shape: f32[2,8,64], index: 3, kind: output, shape index: {}]  }
   0x1   :  { %s473_s14 = smov 0  }
   0x2 LB: > { %s25_s15 = sadd.s32 1, %s440_s13  ;;  %p372_p0 = scmp.ge.s32.totalorder %s444_s14, 1  ;;  %s444_s14 = sphi %s473_s14, %s13_s14   ;;  %s440_s13 = sphi %s471_s13, %s513_s13   ;;  %s436_s12 = sphi %s469_s12, %s512_s12  }
   0x3   : > { %p27_p1 = scmp.ge.s32.totalorder %s25_s15, 2  ;;  %p156_p2 = scmp.lt.s32.totalorder %s444_s14, 3 }
   0x5   : > { %s515_s15 = smov (%p27_p1, %s25_s15), 0  ;;  %p157_p3 = pnand %p372_p0, %p156_p2 }
   0x6   : > { %p185_p4 = scmp.lt.s32.totalorder (!%p157_p3), %s436_s12, 1 }
   0x7   : > { %160 = sbr.rel (%p157_p3) target bundleno = 251 (0xfb), region = 32 }
   0xc   : > { %v446_v0 = vmov 0.0   ;;  %vm447_vm0 = vmmov 0   ;;  %v203_v1 = vld [vmem:[%s510_s2] sm:$0xff]  ;;  %s517_s12 = smov (!%p185_p4, %s436_s12), 1  ;;  %v448_v2 = vmov 0   ;;  %vm209_vm1 = vcmask 130048  }
   0xd   : > { %383 = vmatprep.subr.mxu0 %v446_v0  ;;  %387 = vmatprep.mubr.msk.f32.mxu0 %vm447_vm0, %v446_v0  ;;  %s379_s18 = sshll.u32 %s517_s12, 4  ;;  %v200_v5 = vld [vmem:[%s509_s1] sm:$0xff]  ;;  %s375_s24 = sshll.u32 %s517_s12, 3  ;;  %vm289_vm2 = vcmask 523264  }
   0xe   : > { %417 = vset.pattern.permute.xlu0 %v448_v2  ;;  %s192_s21 = scalar_lea.vmem %s508_s0, %s379_s18  ;;  %s199_s27 = scalar_lea.vmem %s511_s3, %s375_s24 }
   0xf   : > { %206 = vperm.xlu0 %417, %v203_v1   ;;  %v202_v3 = vld [vmem:[%s192_s21 + $0x8] sm:$0xff]  ;;  %v201_v4 = vld [vmem:[%s192_s21] sm:$0xff] }
  0x10   : > { %384 = vmatpush3.msra.mxu0 %v202_v3 }
  0x11   : > { %385 = vmatprep.subr.mxu0 %v446_v0 }
  0x12   : > { %386 = vmatpush3.msra.mxu0 %v201_v4 }
  0x13   : > { %388 = vmatmul.mubr.msk.f32.vlgmr.msra.gmra.mxu0 %vm209_vm1, %v200_v5 }
  0x8a   : > { %v207_v6 = vpop.permute.xlu0 %206 }
  0xd3   : > { %v279_v7 = vpop.f32.mrf.mxu0 }
  0xd4   : > { %v280_v8 = vadd.f32 %v279_v7, %v207_v6 }
  0xd5   : > { %v389_v9 = vpop.f32.mrf.mxu0 }
  0xd6   : > { %v283_v10 = vsub.f32 0.0, %v280_v8 }
  0xd8   : > { %v284_v11 = vmul.f32 1.442695, %v283_v10 }
  0xda   : > { %418 = vpow2.f32 %v284_v11 }
  0xe7   : > { %v419_v12 = vpop.eup %418 }
  0xe8   : > { %v286_v13 = vadd.f32 1.0, %v419_v12 }
  0xea   : > { %420 = vrcp.f32 %v286_v13 }
  0xf7   : > { %v421_v14 = vpop.eup %420 }
  0xf8   : > { %v288_v15 = vmul.f32 %v421_v14, %v280_v8 }
  0xfa   : > { %290 = vst.msk [vmem:[%s199_s27] sm:$0xff] %vm289_vm2, %v288_v15 }
  0xfb PF: > { %s13_s14 = sadd.s32 1, %s444_s14   ;;  %s512_s12 = smov %s440_s13 }
  0xfc   : > { %p10_p5 = scmp.ge.s32.totalorder %s13_s14, 4   ;;  %s513_s13 = smov %s515_s15 }
  0xfe   :  { %12 = sbr.rel (!%p10_p5) target bundleno = 2 (0x2), region = 62 }

</bundles_post_ra>
